<compile_context>
chip_gen: v7x
topology: tpu7x:2x2x1
jax: 0.10.0
libtpu: 0.0.40
codegen_flags: <defaults>
</compile_context>

<pallas_src>
import functools
import math

import jax
import jax.numpy as jnp
from jax import lax
from jax.experimental import pallas as pl
from jax.experimental.pallas import tpu as pltpu


def _cross_attention_kernel(q_ref, v_ref, w_ref, b_ref, o_ref, *, sv_valid):
    """B_blk batch elements per grid step: projections + attention + dense.

    q_ref: (B_blk, Sq_p, Ep)  zero-padded queries                      (f32)
    v_ref: (B_blk, Sv_p, Ep)  zero-padded cross-attention values input (f32)
    w_ref: (4, Ep, Ep)        packed [Wv, Wk, Wq*scale, Wd], (in, out) (bf16)
    b_ref: (4, 1, Ep)         packed [bv, bk, bq*scale, bd]            (f32)
    o_ref: (B_blk, Sq_p, Ep)
    """
    bb, sq, ep = q_ref.shape
    _, sv, _ = v_ref.shape

    # Flatten batch into the matmul M dimension.  All reshapes happen on f32
    # values with sq a multiple of 8 and ep a multiple of 128, so they are
    # layout-preserving (no VMEM relayout copies).
    q2 = q_ref[...].reshape(bb * sq, ep).astype(jnp.bfloat16)
    v2 = v_ref[...].reshape(bb * sv, ep).astype(jnp.bfloat16)

    # values = Linear_v(values); keys = Linear_k(projected values);
    # queries = Linear_q(queries).  Weights pre-transposed to (in, out); the
    # softmax scale is already folded into w_ref[2]/b_ref[2].  bf16 operands,
    # f32 accumulation + f32 bias add.
    v_p = jnp.dot(v2, w_ref[0], preferred_element_type=jnp.float32) + b_ref[0]
    k_p = jnp.dot(v_p.astype(jnp.bfloat16), w_ref[1],
                  preferred_element_type=jnp.float32) + b_ref[1]
    q_p = jnp.dot(q2, w_ref[2], preferred_element_type=jnp.float32) + b_ref[2]

    q3 = q_p.reshape(bb, sq, ep).astype(jnp.bfloat16)
    k3 = k_p.reshape(bb, sv, ep).astype(jnp.bfloat16)
    v3 = v_p.reshape(bb, sv, ep).astype(jnp.bfloat16)

    # Scores: contract the feature axis directly (no materialized K transpose).
    w = lax.dot_general(q3, k3, (((2,), (2,)), ((0,), (0,))),
                        preferred_element_type=jnp.float32)      # (bb, sq, sv)

    # Mask padded key columns: zero-padded V rows project to the bias, so the
    # padded scores are NOT zero and would leak softmax mass otherwise.
    if sv_valid < sv:
        kv_idx = lax.broadcasted_iota(jnp.int32, (1, 1, sv), 2)
        w = jnp.where(kv_idx < sv_valid, w, -1e30)

    # Softmax in f32 (VPU/EUP); approx reciprocal rides the EUP slot.
    # TODO(synk): for large Sv (diffusion cross-attn to long contexts), switch
    # this to an online flash-style Sv-tiled loop with m/l/acc VMEM scratch.
    w = w - jnp.max(w, axis=-1, keepdims=True)
    p = jnp.exp(w)
    attn = p * pl.reciprocal(jnp.sum(p, axis=-1, keepdims=True), approx=True)

    out = lax.dot_general(attn.astype(jnp.bfloat16), v3,
                          (((2,), (1,)), ((0,), (0,))),
                          preferred_element_type=jnp.float32)    # (bb, sq, ep)

    # x = dense(out)
    res = jnp.dot(out.reshape(bb * sq, ep).astype(jnp.bfloat16), w_ref[3],
                  preferred_element_type=jnp.float32) + b_ref[3]
    o_ref[...] = res.reshape(bb, sq, ep).astype(o_ref.dtype)


def _estimate_vmem_bytes(b_blk, sq, sv, ep):
    """Rough per-step VMEM footprint (bytes) for block-size selection."""
    f32, bf16 = 4, 2
    total = 0
    # Pipelined activation blocks (double-buffered by pallas_call).
    total += 2 * b_blk * sq * ep * f32          # q block
    total += 2 * b_blk * sv * ep * f32          # v block
    total += 2 * b_blk * sq * ep * f32          # out block
    # Constant weight/bias blocks (single-buffered via pl.Buffered(1)).
    total += 4 * ep * ep * bf16                 # packed weights
    total += 4 * ep * f32                       # packed biases
    # Live intermediates inside the body (f32 results + bf16 matmul operands).
    total += (2 * b_blk * sv * ep + 2 * b_blk * sq * ep) * f32   # v_p,k_p,q_p,out
    total += (2 * b_blk * sv * ep + 2 * b_blk * sq * ep) * bf16  # bf16 casts
    total += 2 * b_blk * sq * sv * f32          # scores + exp
    total += b_blk * sq * sv * bf16             # attn (bf16)
    return total


def _tpu_cores_and_vmem():
    """(tensorcores per chip, VMEM capacity bytes) with conservative fallbacks."""
    cores, vmem_cap = 1, 64 << 20
    try:
        vmem_cap = int(pltpu.get_tpu_info().vmem_capacity_bytes)
    except Exception:
        pass
    try:
        if "v7" in jax.devices()[0].device_kind.lower():
            cores = 2
    except Exception:
        pass
    return cores, vmem_cap


def _pick_batch_block(n, sq, sv, ep, vmem_budget, num_cores):
    """Largest divisor of n whose footprint fits the VMEM budget.

    On single-core chips (v5e/v6e) fewer, bigger grid steps is strictly better
    (per-step overhead, bigger MXU M tiles), so we do not force >= 2 steps.
    On v7x (2 TCs) we prefer a grid length that is a multiple of the core
    count so both cores get equal work.
    """
    feasible = [d for d in range(1, n + 1)
                if n % d == 0 and _estimate_vmem_bytes(d, sq, sv, ep) <= vmem_budget]
    if not feasible:
        return 1

    def score(d):
        steps = n // d
        balanced = (steps % num_cores) == 0
        return (balanced, -steps)          # balanced grid, then fewest steps

    return max(feasible, key=score)


def cross_attention(q, v, params, heads, *, batch_block=None):
    """q: (N, Sq, head_dim), v: (N, Sv, head_dim) -> (N, Sq, head_dim)."""
    N, Sq, E = q.shape
    _, Sv, Ev = v.shape
    assert E == Ev
    head_dim = E  # input feature dim feeds Linear(head_dim, head_dim)
    # TODO(synk): the reference PyTorch module cannot execute with heads > 1
    # (its dense layer would receive last-dim == head_dim but expects
    # embed_dim), so only the heads == 1 configuration is implemented here.
    assert heads == 1, "CrossAttention.forward only type-checks for heads == 1"
    scale = 1.0 / math.sqrt(head_dim)

    wv, bv, wk, bk, wq, bq, wd, bd = params  # PyTorch layout: W (out,in), b (out,)

    # Lane-dense feature dim; sublane-aligned Sq; lane-dense Sv (for the score
    # tile and the softmax reductions).
    Ep = max(128, ((E + 127) // 128) * 128)
    Sq_p = ((Sq + 7) // 8) * 8
    Sv_p = max(128, ((Sv + 127) // 128) * 128)

    def prep(w, b, fold=1.0):
        # One-time transform: fold scale, transpose to (in, out), zero-pad,
        # store the weight in bf16 (MXU-native).  Biases stay f32 (added after
        # the f32-accumulated matmul).  In production these packed params
        # would be precomputed once.
        wt = jnp.zeros((Ep, Ep), jnp.float32).at[:E, :E].set((w * fold).T)
        bp = jnp.zeros((1, Ep), jnp.float32).at[0, :E].set(b.reshape(-1) * fold)
        return wt.astype(jnp.bfloat16), bp

    wv_t, bv_p = prep(wv, bv)
    wk_t, bk_p = prep(wk, bk)
    wq_t, bq_p = prep(wq, bq, fold=scale)     # softmax scale folded into Q proj
    wd_t, bd_p = prep(wd, bd)
    w_all = jnp.stack([wv_t, wk_t, wq_t, wd_t])    # (4, Ep, Ep) bf16
    b_all = jnp.stack([bv_p, bk_p, bq_p, bd_p])    # (4, 1, Ep)  f32

    q_pad = jnp.pad(q, ((0, 0), (0, Sq_p - Sq), (0, Ep - E))) \
        if (Sq_p != Sq or Ep != E) else q
    v_pad = jnp.pad(v, ((0, 0), (0, Sv_p - Sv), (0, Ep - E))) \
        if (Sv_p != Sv or Ep != E) else v

    num_cores, vmem_cap = _tpu_cores_and_vmem()
    vmem_budget = int(vmem_cap * 0.6)          # headroom for compiler scratch
    if batch_block is not None:
        b_blk = batch_block
    else:
        b_blk = _pick_batch_block(N, Sq_p, Sv_p, Ep, vmem_budget, num_cores)
    assert N % b_blk == 0
    grid = (N // b_blk,)

    est = _estimate_vmem_bytes(b_blk, Sq_p, Sv_p, Ep)
    vmem_limit = int(min(max(2 * est, 32 << 20),
                         max(vmem_cap - (8 << 20), 32 << 20)))

    flops = int(2 * N * (2 * Sv_p + 2 * Sq_p) * Ep * Ep      # 4 dense layers
                + 4 * N * Sq_p * Sv_p * Ep)                  # scores + attn@V
    transcendentals = int(N * Sq_p * Sv_p)                   # exp
    bytes_accessed = int(q_pad.size * 4 + v_pad.size * 4 + N * Sq_p * Ep * 4
                         + w_all.size * 2 + b_all.size * 4)

    kernel = functools.partial(_cross_attention_kernel, sv_valid=Sv)

    out = pl.pallas_call(
        kernel,
        out_shape=jax.ShapeDtypeStruct((N, Sq_p, Ep), q.dtype),
        grid=grid,
        in_specs=[
            pl.BlockSpec((b_blk, Sq_p, Ep), lambda i: (i, 0, 0)),   # queries
            pl.BlockSpec((b_blk, Sv_p, Ep), lambda i: (i, 0, 0)),   # values
            # Constant blocks: single-buffered (index_map is (0,0,0) every
            # step, so double-buffering buys nothing and doubles VMEM use).
            pl.BlockSpec((4, Ep, Ep), lambda i: (0, 0, 0),
                         pipeline_mode=pl.Buffered(1)),             # weights
            pl.BlockSpec((4, 1, Ep), lambda i: (0, 0, 0),
                         pipeline_mode=pl.Buffered(1)),             # biases
        ],
        out_specs=pl.BlockSpec((b_blk, Sq_p, Ep), lambda i: (i, 0, 0)),
        compiler_params=pltpu.CompilerParams(
            dimension_semantics=("parallel",),
            vmem_limit_bytes=vmem_limit),
        cost_estimate=pl.CostEstimate(flops=flops,
                                      transcendentals=transcendentals,
                                      bytes_accessed=bytes_accessed),
    )(q_pad, v_pad, w_all, b_all)

    if Sq_p == Sq and Ep == E:
        return out                       # no padding -> no extra HBM copy
    return out[:, :Sq, :E]


def init_params(key, embed_dim, heads):
    """Deterministic nn.Linear-style init (uniform(-1/sqrt(fan_in), 1/sqrt(fan_in)))."""
    head_dim = embed_dim // heads
    ks = jax.random.split(key, 8)

    def linear(kw, kb, out_f, in_f):
        bound = 1.0 / math.sqrt(in_f)
        w = jax.random.uniform(kw, (out_f, in_f), jnp.float32, -bound, bound)
        b = jax.random.uniform(kb, (out_f,), jnp.float32, -bound, bound)
        return w, b

    wv, bv = linear(ks[0], ks[1], head_dim, head_dim)
    wk, bk = linear(ks[2], ks[3], head_dim, head_dim)
    wq, bq = linear(ks[4], ks[5], head_dim, head_dim)
    wd, bd = linear(ks[6], ks[7], embed_dim, heads * head_dim)
    return (wv, bv, wk, bk, wq, bq, wd, bd)


def reference(q, v, params, heads, embed_dim):
    """Pure-JAX f32 transcription of the PyTorch forward (correctness check)."""
    wv, bv, wk, bk, wq, bq, wd, bd = params
    n, seq_len, in_dim = q.shape
    head_dim = embed_dim // heads
    vp = v @ wv.T + bv
    kp = vp @ wk.T + bk
    qp = q @ wq.T + bq

    def split(x):  # .view(n, -1, heads, embed_dim).transpose(1, 2)
        return jnp.transpose(x.reshape(n, -1, heads, embed_dim), (0, 2, 1, 3))

    qh, kh, vh = split(qp), split(kp), split(vp)
    w = jnp.einsum("nhqe,nhke->nhqk", qh, kh) / math.sqrt(head_dim)
    attn = jax.nn.softmax(w, axis=-1)
    out = jnp.einsum("nhqk,nhke->nhqe", attn, vh)
    out = jnp.transpose(out, (0, 2, 1, 3)).reshape(n, seq_len, in_dim)
    return out @ wd.T + bd


if __name__ == "__main__":
    heads = 1
    embed_dim = 32
    head_dim = embed_dim // heads
    N, Sq, Sv = 2, 8, 16

    key = jax.random.PRNGKey(0)
    kq, kv, kp = jax.random.split(key, 3)
    q = jax.random.normal(kq, (N, Sq, head_dim), jnp.float32)
    v = jax.random.normal(kv, (N, Sv, head_dim), jnp.float32)
    params = init_params(kp, embed_dim, heads)

    out = cross_attention(q, v, params, heads)
    out = jax.block_until_ready(out)

    ref = reference(q, v, params, heads, embed_dim)
    assert out.shape == (N, Sq, head_dim)
    # Loosened tolerance: bf16 MXU operands (f32 accumulation) plus the approx
    # EUP reciprocal in the softmax denominator.
    assert jnp.allclose(out, ref, atol=3e-2, rtol=3e-2), "mismatch vs reference"
    print("KERNEL_OK")
</pallas_src>

<mosaic_0001>
module attributes {stable_mosaic.version = 11 : i64} {
  func.func @_cross_attention_kernel(%arg0: i32, %arg1: memref<2x8x128xf32, #tpu.memory_space<vmem>>, %arg2: memref<2x128x128xf32, #tpu.memory_space<vmem>>, %arg3: memref<4x128x128xbf16, #tpu.memory_space<vmem>>, %arg4: memref<4x1x128xf32, #tpu.memory_space<vmem>>, %arg5: memref<2x8x128xf32, #tpu.memory_space<vmem>>) attributes {dimension_semantics = [#tpu.dimension_semantics<parallel>], iteration_bounds = array<i64: 1>, scalar_prefetch = 0 : i64, scratch_operands = 0 : i64, tpu.core_type = #tpu.core_type<tc>, window_params = [{transform_indices = @transform_0, window_bounds = array<i64: 2, 8, 128>}, {transform_indices = @transform_1, window_bounds = array<i64: 2, 128, 128>}, {pipeline_mode = #tpu.pipeline_mode<synchronous>, transform_indices = @transform_2, window_bounds = array<i64: 4, 128, 128>}, {pipeline_mode = #tpu.pipeline_mode<synchronous>, transform_indices = @transform_3, window_bounds = array<i64: 4, 1, 128>}, {transform_indices = @transform_4, window_bounds = array<i64: 2, 8, 128>}]} {
    %c0 = arith.constant 0 : index
    %c0_0 = arith.constant 0 : index
    %c0_1 = arith.constant 0 : index
    %0 = vector.load %arg1[%c0, %c0_0, %c0_1] : memref<2x8x128xf32, #tpu.memory_space<vmem>>, vector<2x8x128xf32>
    %1 = vector.shape_cast %0 : vector<2x8x128xf32> to vector<16x128xf32>
    %2 = arith.truncf %1 : vector<16x128xf32> to vector<16x128xbf16>
    %c0_2 = arith.constant 0 : index
    %c0_3 = arith.constant 0 : index
    %c0_4 = arith.constant 0 : index
    %3 = vector.load %arg2[%c0_2, %c0_3, %c0_4] : memref<2x128x128xf32, #tpu.memory_space<vmem>>, vector<2x128x128xf32>
    %4 = vector.shape_cast %3 : vector<2x128x128xf32> to vector<256x128xf32>
    %5 = arith.truncf %4 : vector<256x128xf32> to vector<256x128xbf16>
    %c0_5 = arith.constant 0 : index
    %c0_6 = arith.constant 0 : index
    %c0_7 = arith.constant 0 : index
    %6 = vector.load %arg3[%c0_5, %c0_6, %c0_7] : memref<4x128x128xbf16, #tpu.memory_space<vmem>>, vector<1x128x128xbf16>
    %7 = vector.shape_cast %6 : vector<1x128x128xbf16> to vector<128x128xbf16>
    %cst = arith.constant dense<0.000000e+00> : vector<256x128xf32>
    %8 = tpu.matmul %5, %7, %cst {dimension_numbers = #tpu.dot_dimension_numbers<[1], [0], [0], [1], [0, 0, 1, 1], [], []>} : vector<256x128xbf16>, vector<128x128xbf16>, vector<256x128xf32> -> vector<256x128xf32>
    %c0_8 = arith.constant 0 : index
    %c0_9 = arith.constant 0 : index
    %c0_10 = arith.constant 0 : index
    %9 = vector.load %arg4[%c0_8, %c0_9, %c0_10] : memref<4x1x128xf32, #tpu.memory_space<vmem>>, vector<1x1x128xf32>
    %10 = vector.shape_cast %9 : vector<1x1x128xf32> to vector<1x128xf32>
    %11 = vector.broadcast %10 : vector<1x128xf32> to vector<256x128xf32>
    %12 = arith.addf %8, %11 : vector<256x128xf32>
    %13 = arith.truncf %12 : vector<256x128xf32> to vector<256x128xbf16>
    %c1 = arith.constant 1 : index
    %c0_11 = arith.constant 0 : index
    %c0_12 = arith.constant 0 : index
    %14 = vector.load %arg3[%c1, %c0_11, %c0_12] : memref<4x128x128xbf16, #tpu.memory_space<vmem>>, vector<1x128x128xbf16>
    %15 = vector.shape_cast %14 : vector<1x128x128xbf16> to vector<128x128xbf16>
    %cst_13 = arith.constant dense<0.000000e+00> : vector<256x128xf32>
    %16 = tpu.matmul %13, %15, %cst_13 {dimension_numbers = #tpu.dot_dimension_numbers<[1], [0], [0], [1], [0, 0, 1, 1], [], []>} : vector<256x128xbf16>, vector<128x128xbf16>, vector<256x128xf32> -> vector<256x128xf32>
    %c1_14 = arith.constant 1 : index
    %c0_15 = arith.constant 0 : index
    %c0_16 = arith.constant 0 : index
    %17 = vector.load %arg4[%c1_14, %c0_15, %c0_16] : memref<4x1x128xf32, #tpu.memory_space<vmem>>, vector<1x1x128xf32>
    %18 = vector.shape_cast %17 : vector<1x1x128xf32> to vector<1x128xf32>
    %19 = vector.broadcast %18 : vector<1x128xf32> to vector<256x128xf32>
    %20 = arith.addf %16, %19 : vector<256x128xf32>
    %c2 = arith.constant 2 : index
    %c0_17 = arith.constant 0 : index
    %c0_18 = arith.constant 0 : index
    %21 = vector.load %arg3[%c2, %c0_17, %c0_18] : memref<4x128x128xbf16, #tpu.memory_space<vmem>>, vector<1x128x128xbf16>
    %22 = vector.shape_cast %21 : vector<1x128x128xbf16> to vector<128x128xbf16>
    %cst_19 = arith.constant dense<0.000000e+00> : vector<16x128xf32>
    %23 = tpu.matmul %2, %22, %cst_19 {dimension_numbers = #tpu.dot_dimension_numbers<[1], [0], [0], [1], [0, 0, 1, 1], [], []>} : vector<16x128xbf16>, vector<128x128xbf16>, vector<16x128xf32> -> vector<16x128xf32>
    %c2_20 = arith.constant 2 : index
    %c0_21 = arith.constant 0 : index
    %c0_22 = arith.constant 0 : index
    %24 = vector.load %arg4[%c2_20, %c0_21, %c0_22] : memref<4x1x128xf32, #tpu.memory_space<vmem>>, vector<1x1x128xf32>
    %25 = vector.shape_cast %24 : vector<1x1x128xf32> to vector<1x128xf32>
    %26 = vector.broadcast %25 : vector<1x128xf32> to vector<16x128xf32>
    %27 = arith.addf %23, %26 : vector<16x128xf32>
    %28 = vector.shape_cast %27 : vector<16x128xf32> to vector<2x8x128xf32>
    %29 = arith.truncf %28 : vector<2x8x128xf32> to vector<2x8x128xbf16>
    %30 = vector.shape_cast %20 : vector<256x128xf32> to vector<2x128x128xf32>
    %31 = arith.truncf %30 : vector<2x128x128xf32> to vector<2x128x128xbf16>
    %32 = vector.shape_cast %12 : vector<256x128xf32> to vector<2x128x128xf32>
    %33 = arith.truncf %32 : vector<2x128x128xf32> to vector<2x128x128xbf16>
    %cst_23 = arith.constant dense<0.000000e+00> : vector<2x8x128xf32>
    %34 = tpu.matmul %29, %31, %cst_23 {dimension_numbers = #tpu.dot_dimension_numbers<[2], [2], [1], [1], [0, 0, 0, 1, 1, 1], [0], [0]>} : vector<2x8x128xbf16>, vector<2x128x128xbf16>, vector<2x8x128xf32> -> vector<2x8x128xf32>
    %35 = tpu.iota {dimensions = array<i32: 2>} : vector<1x1x128xi32>
    %c16_i32 = arith.constant 16 : i32
    %36 = vector.broadcast %c16_i32 : i32 to vector<1x1x128xi32>
    %37 = arith.cmpi slt, %35, %36 : vector<1x1x128xi32>
    %cst_24 = arith.constant -1.000000e+30 : f32
    %38 = vector.shape_cast %37 : vector<1x1x128xi1> to vector<1x1x128xi1>
    %39 = vector.broadcast %38 : vector<1x1x128xi1> to vector<2x8x128xi1>
    %40 = vector.broadcast %cst_24 : f32 to vector<2x8x128xf32>
    %41 = arith.select %39, %34, %40 : vector<2x8x128xi1>, vector<2x8x128xf32>
    %cst_25 = arith.constant dense<0xFF800000> : vector<2x8xf32>
    %42 = vector.multi_reduction <maximumf>, %41, %cst_25 [2] : vector<2x8x128xf32> to vector<2x8xf32>
    %43 = vector.shape_cast %42 : vector<2x8xf32> to vector<2x8x1xf32>
    %44 = vector.broadcast %43 : vector<2x8x1xf32> to vector<2x8x128xf32>
    %45 = arith.subf %41, %44 : vector<2x8x128xf32>
    %46 = math.exp %45 : vector<2x8x128xf32>
    %cst_26 = arith.constant dense<0.000000e+00> : vector<2x8xf32>
    %47 = vector.multi_reduction <add>, %46, %cst_26 [2] : vector<2x8x128xf32> to vector<2x8xf32>
    %48 = vector.shape_cast %47 : vector<2x8xf32> to vector<2x8x1xf32>
    %49 = tpu.reciprocal %48 {approx = true} : vector<2x8x1xf32> -> vector<2x8x1xf32>
    %50 = vector.broadcast %49 : vector<2x8x1xf32> to vector<2x8x128xf32>
    %51 = arith.mulf %46, %50 : vector<2x8x128xf32>
    %52 = arith.truncf %51 : vector<2x8x128xf32> to vector<2x8x128xbf16>
    %cst_27 = arith.constant dense<0.000000e+00> : vector<2x8x128xf32>
    %53 = tpu.matmul %52, %33, %cst_27 {dimension_numbers = #tpu.dot_dimension_numbers<[2], [1], [1], [2], [0, 0, 0, 1, 1, 2], [0], [0]>} : vector<2x8x128xbf16>, vector<2x128x128xbf16>, vector<2x8x128xf32> -> vector<2x8x128xf32>
    %54 = vector.shape_cast %53 : vector<2x8x128xf32> to vector<16x128xf32>
    %55 = arith.truncf %54 : vector<16x128xf32> to vector<16x128xbf16>
    %c3 = arith.constant 3 : index
    %c0_28 = arith.constant 0 : index
    %c0_29 = arith.constant 0 : index
    %56 = vector.load %arg3[%c3, %c0_28, %c0_29] : memref<4x128x128xbf16, #tpu.memory_space<vmem>>, vector<1x128x128xbf16>
    %57 = vector.shape_cast %56 : vector<1x128x128xbf16> to vector<128x128xbf16>
    %cst_30 = arith.constant dense<0.000000e+00> : vector<16x128xf32>
    %58 = tpu.matmul %55, %57, %cst_30 {dimension_numbers = #tpu.dot_dimension_numbers<[1], [0], [0], [1], [0, 0, 1, 1], [], []>} : vector<16x128xbf16>, vector<128x128xbf16>, vector<16x128xf32> -> vector<16x128xf32>
    %c3_31 = arith.constant 3 : index
    %c0_32 = arith.constant 0 : index
    %c0_33 = arith.constant 0 : index
    %59 = vector.load %arg4[%c3_31, %c0_32, %c0_33] : memref<4x1x128xf32, #tpu.memory_space<vmem>>, vector<1x1x128xf32>
    %60 = vector.shape_cast %59 : vector<1x1x128xf32> to vector<1x128xf32>
    %61 = vector.broadcast %60 : vector<1x128xf32> to vector<16x128xf32>
    %62 = arith.addf %58, %61 : vector<16x128xf32>
    %63 = vector.shape_cast %62 : vector<16x128xf32> to vector<2x8x128xf32>
    %c0_34 = arith.constant 0 : index
    %c0_35 = arith.constant 0 : index
    %c0_36 = arith.constant 0 : index
    %64 = vector.load %arg5[%c0_34, %c0_35, %c0_36] : memref<2x8x128xf32, #tpu.memory_space<vmem>>, vector<2x8x128xf32>
    tpu.vector_store %arg5[%c0_34, %c0_35, %c0_36], %63 {strides = array<i32>} : memref<2x8x128xf32, #tpu.memory_space<vmem>>, vector<2x8x128xf32>,
    return
  }
  func.func @transform_0(%arg0: i32) -> (i32, i32, i32) {
    %c0_i32 = arith.constant 0 : i32
    %c0_i32_0 = arith.constant 0 : i32
    %c0_i32_1 = arith.constant 0 : i32
    return %arg0, %c0_i32, %c0_i32_0 : i32, i32, i32
  }
  func.func @transform_1(%arg0: i32) -> (i32, i32, i32) {
    %c0_i32 = arith.constant 0 : i32
    %c0_i32_0 = arith.constant 0 : i32
    %c0_i32_1 = arith.constant 0 : i32
    return %arg0, %c0_i32, %c0_i32_0 : i32, i32, i32
  }
  func.func @transform_2(%arg0: i32) -> (i32, i32, i32) {
    %c0_i32 = arith.constant 0 : i32
    %c0_i32_0 = arith.constant 0 : i32
    %c0_i32_1 = arith.constant 0 : i32
    %c0_i32_2 = arith.constant 0 : i32
    return %c0_i32, %c0_i32_0, %c0_i32_1 : i32, i32, i32
  }
  func.func @transform_3(%arg0: i32) -> (i32, i32, i32) {
    %c0_i32 = arith.constant 0 : i32
    %c0_i32_0 = arith.constant 0 : i32
    %c0_i32_1 = arith.constant 0 : i32
    %c0_i32_2 = arith.constant 0 : i32
    return %c0_i32, %c0_i32_0, %c0_i32_1 : i32, i32, i32
  }
  func.func @transform_4(%arg0: i32) -> (i32, i32, i32) {
    %c0_i32 = arith.constant 0 : i32
    %c0_i32_0 = arith.constant 0 : i32
    %c0_i32_1 = arith.constant 0 : i32
    return %arg0, %c0_i32, %c0_i32_0 : i32, i32, i32
  }
}

</mosaic_0001>

<bundles_post_ra>
// kernel: tpu_custom_call.1
= control target key start
LH: loop header
LB: loop body
LE: loop exit
PB: predicated region body
PF: predicated region fallthrough
CT: control target
= control target key end

     0   :  { %9 = vsyncpa [#allocation3], 0  ;;  %s1860_s0 = inlined_call_operand.hbm [shape: f32[2,8,128], index: 0, kind: input, shape index: {}]   ;;  %s1861_s1 = inlined_call_operand.hbm [shape: f32[2,128,128], index: 1, kind: input, shape index: {}]   ;;  %s1862_s2 = inlined_call_operand.hbm [shape: bf16[4,128,128], index: 2, kind: input, shape index: {}]   ;;  %s1863_s3 = inlined_call_operand.vmem [shape: f32[4,1,128], index: 3, kind: input, shape index: {}]   ;;  %s1864_s4 = inlined_call_operand.hbm [shape: f32[2,8,128], index: 4, kind: output, shape index: {}]  }
   0x1   :  { %10 = vsyncpa [#allocation6], 0 }
   0x2   :  { %11 = vsyncpa [#allocation4], 0  ;;  %s1548_s15 = smov [#allocation5]   ;;  %s1549_s17 = smov [#allocation2]  }
   0x3   :  { %s29_s16 = sshll.u32 %s1548_s15, 4  ;;  %s17_s18 = sshll.u32 %s1549_s17, 4  ;;  %s30_s16 = int_to_ptr.vmem [resolvable:$true] %s29_s16  ;;  %s1583_s18 = int_to_ptr.vmem [resolvable:$true] %s17_s18 }
   0x4   :  { %s1454_s21 = scalar_lea.hbm %s1861_s1, 4096 }
   0x5   :  { %p1455_p0 = scmp.ne.s32.totalorder %s1861_s1, %s1454_s21  ;;  %p1458_p1 = scmp.lt.u32.totalorder %s1454_s21, %s1861_s1 }
   0x7   :  { %p1460_p2 = pnand %p1458_p1, %p1455_p0 }
   0x9   :  { %1463 = shalt.err (!%p1460_p2)
}
   0xa   :  { %s1464_s26 = scalar_lea.vmem %s30_s16, 4096  ;;  %p1469_p4 = scmp.lt.s32.totalorder %s30_s16, %s30_s16 }
   0xb   :  { %p1465_p3 = scmp.ne.s32.totalorder %s30_s16, %s1464_s26  ;;  %p1470_p5 = scmp.lt.s32.totalorder %s1464_s26, %s1464_s26 }
   0xd   :  { %p1471_p6 = por %p1470_p5, %p1469_p4 }
   0xf   :  { %p1472_p7 = pnand %p1471_p6, %p1465_p3 }
  0x11   :  { %1475 = shalt.err (!%p1472_p7)
}
  0x12   :  { %s1550_s27 = smov 128   ;;  %s1551_s28 = smov 8  }
  0x13   :  { %35 = dma.hbm_to_vmem [thread:$0]  %s1861_s1, 4096, %s30_s16, [#allocation6], %s1550_s27, %s1550_s27, %s1551_s28  }
  0x14   :  { %s1476_s7 = scalar_lea.hbm %s1860_s0, 256 }
  0x15   :  { %p1477_p8 = scmp.ne.s32.totalorder %s1860_s0, %s1476_s7  ;;  %p1480_p9 = scmp.lt.u32.totalorder %s1476_s7, %s1860_s0 }
  0x17   :  { %p1482_p10 = pnand %p1480_p9, %p1477_p8 }
  0x19   :  { %1485 = shalt.err (!%p1482_p10)
}
  0x1a   :  { %s1486_s12 = scalar_lea.vmem %s1583_s18, 256  ;;  %p1491_p12 = scmp.lt.s32.totalorder %s1583_s18, %s1583_s18 }
  0x1b   :  { %p1487_p11 = scmp.ne.s32.totalorder %s1583_s18, %s1486_s12  ;;  %p1492_p13 = scmp.lt.s32.totalorder %s1486_s12, %s1486_s12 }
  0x1d   :  { %p1493_p0 = por %p1492_p13, %p1491_p12 }
  0x1f   :  { %p1494_p1 = pnand %p1493_p0, %p1487_p11 }
  0x21   :  { %1497 = shalt.err (!%p1494_p1)
}
  0x22   :  { %23 = dma.hbm_to_vmem [thread:$0]  %s1860_s0, 256, %s1583_s18, [#allocation3], %s1550_s27, %s1550_s27, %s1551_s28  }
  0x23   :  { %s1552_s14 = smov [#allocation7]   ;;  %s1498_s19 = scalar_lea.hbm %s1862_s2, 4096 }
  0x24   :  { %s41_s15 = sshll.u32 %s1552_s14, 4  ;;  %p1499_p2 = scmp.ne.s32.totalorder %s1862_s2, %s1498_s19  ;;  %s42_s15 = int_to_ptr.vmem [resolvable:$true] %s41_s15 }
  0x25   :  { %p1502_p3 = scmp.lt.u32.totalorder %s1498_s19, %s1862_s2 }
  0x27   :  { %p1504_p4 = pnand %p1502_p3, %p1499_p2 }
  0x29   :  { %1507 = shalt.err (!%p1504_p4)
}
  0x2a   :  { %s1508_s24 = scalar_lea.vmem %s42_s15, 4096  ;;  %p1513_p6 = scmp.lt.s32.totalorder %s42_s15, %s42_s15 }
  0x2b   :  { %p1509_p5 = scmp.ne.s32.totalorder %s42_s15, %s1508_s24  ;;  %p1514_p7 = scmp.lt.s32.totalorder %s1508_s24, %s1508_s24 }
  0x2d   :  { %p1515_p8 = por %p1514_p7, %p1513_p6 }
  0x2f   :  { %p1516_p9 = pnand %p1515_p8, %p1509_p5 }
  0x31   :  { %1519 = shalt.err (!%p1516_p9)
}
  0x32   :  { %s1553_s0 = smov 64   ;;  %s1554_s18 = smov 4  }
  0x33   :  { %47 = dma.hbm_to_vmem [thread:$0]  %s1862_s2, 4096, %s42_s15, [#allocation6], %s1553_s0, %s1553_s0, %s1554_s18  }
  0x34   :  { %1542 = dma.done.wait [#allocation3], 256  }
  0x35   :  { %1543 = vsyncadd [#allocation3], 4294967040 }
  0x36   :  { %1544 = dma.done.wait [#allocation6], 8192  }
  0x37   :  { %1545 = vsyncadd [#allocation6], 4294959104  ;;  %v1414_v0 = vld [vmem:[#allocation7] sm:$0xff]   ;;  %v1415_v1 = vld [vmem:[#allocation7 + $0x8] sm:$0xff]   ;;  %vm1556_vm0 = vmmov 0   ;;  %s1557_s10 = smov [#allocation8]  }
  0x38   :  { %1188 = vmatprep.subr.bf16.mxu0 %v1414_v0  ;;  %v1416_v2 = vld [vmem:[#allocation7 + $0x10] sm:$0xff]   ;;  %v1417_v3 = vld [vmem:[#allocation7 + $0x18] sm:$0xff]   ;;  %v63_v4 = vld [vmem:[#allocation5] sm:$0xff]  ;;  %s1034_s11 = sshll.u32 %s1557_s10, 4  ;;  %s1035_s11 = int_to_ptr.vmem [resolvable:$true] %s1034_s11 }
  0x39   :  { %1189 = vmatpush3.bf16.msra.mxu0 %v1414_v0  ;;  %v64_v5 = vld [vmem:[#allocation5 + $0x8] sm:$0xff]  ;;  %v1418_v7 = vld [vmem:[#allocation7 + $0x20] sm:$0xff]   ;;  %v1420_v9 = vld [vmem:[#allocation7 + $0x30] sm:$0xff]   ;;  %s1520_s12 = scalar_lea.vmem %s1035_s11, 256  ;;  %p1525_p11 = scmp.lt.s32.totalorder %s1035_s11, %s1035_s11 }
  0x3a   :  { %1190 = vmatprep.subr.bf16.mxu0 %v1415_v1  ;;  %v95_v6 = vpack.c.bf16 %v64_v5, %v63_v4  ;;  %v1419_v8 = vld [vmem:[#allocation7 + $0x28] sm:$0xff]   ;;  %v1422_v10 = vld [vmem:[#allocation7 + $0x40] sm:$0xff]   ;;  %v1424_v12 = vld [vmem:[#allocation7 + $0x50] sm:$0xff]   ;;  %p1521_p10 = scmp.ne.s32.totalorder %s1035_s11, %s1520_s12  ;;  %p1526_p12 = scmp.lt.s32.totalorder %s1520_s12, %s1520_s12 }
  0x3b   :  { %v1423_v11 = vld [vmem:[#allocation7 + $0x48] sm:$0xff]   ;;  %1236 = vmatprep.subr.bf16.mxu1 %v1422_v10  ;;  %v1421_v13 = vld [vmem:[#allocation7 + $0x38] sm:$0xff]   ;;  %v65_v14 = vld [vmem:[#allocation5 + $0x10] sm:$0xff] }
  0x3c   :  { %1204 = vmatprep.mubr.bf16.mxu0 %v95_v6  ;;  %1237 = vmatpush3.bf16.msra.mxu1 %v1422_v10  ;;  %v66_v15 = vld [vmem:[#allocation5 + $0x18] sm:$0xff]  ;;  %v67_v17 = vld [vmem:[#allocation5 + $0x20] sm:$0xff]  ;;  %v68_v18 = vld [vmem:[#allocation5 + $0x28] sm:$0xff]  ;;  %p1527_p13 = por %p1526_p12, %p1525_p11 }
  0x3d   :  { %1191 = vmatpush3.bf16.msra.mxu0 %v1415_v1  ;;  %1238 = vmatprep.subr.bf16.mxu1 %v1423_v11  ;;  %v1425_v16 = vld [vmem:[#allocation7 + $0x58] sm:$0xff]   ;;  %v1426_v19 = vld [vmem:[#allocation7 + $0x60] sm:$0xff]   ;;  %v96_v20 = vpack.c.bf16 %v66_v15, %v65_v14  ;;  %v97_v21 = vpack.c.bf16 %v68_v18, %v67_v17  ;;  %v69_v22 = vld [vmem:[#allocation5 + $0x30] sm:$0xff]  ;;  %v1555_v1 = vmov 0.0  }
  0x3e   :  { %1192 = vmatprep.subr.bf16.mxu0 %v1416_v2  ;;  %v70_v23 = vld [vmem:[#allocation5 + $0x38] sm:$0xff]  ;;  %v1427_v24 = vld [vmem:[#allocation7 + $0x68] sm:$0xff]   ;;  %v71_v25 = vld [vmem:[#allocation5 + $0x40] sm:$0xff]  ;;  %p1528_p0 = pnand %p1527_p13, %p1521_p10 }
  0x3f   :  { %v72_v26 = vld [vmem:[#allocation5 + $0x48] sm:$0xff]  ;;  %v98_v27 = vpack.c.bf16 %v70_v23, %v69_v22  ;;  %v73_v29 = vld [vmem:[#allocation5 + $0x50] sm:$0xff]  ;;  %v74_v30 = vld [vmem:[#allocation5 + $0x58] sm:$0xff] }
  0x40   :  { %1239 = vmatpush3.bf16.msra.mxu1 %v1423_v11  ;;  %v99_v28 = vpack.c.bf16 %v72_v26, %v71_v25  ;;  %v75_v31 = vld [vmem:[#allocation5 + $0x60] sm:$0xff]  ;;  %v76_v32 = vld [vmem:[#allocation5 + $0x68] sm:$0xff]  ;;  %v100_v33 = vpack.c.bf16 %v74_v30, %v73_v29  ;;  %v77_v35 = vld [vmem:[#allocation5 + $0x70] sm:$0xff] }
  0x41   :  { %1193 = vmatpush3.bf16.msra.mxu0 %v1416_v2  ;;  %1240 = vmatprep.subr.bf16.mxu1 %v1424_v12  ;;  %v101_v34 = vpack.c.bf16 %v76_v32, %v75_v31  ;;  %v78_v36 = vld [vmem:[#allocation5 + $0x78] sm:$0xff]  ;;  %v79_v37 = vld [vmem:[#allocation5 + $0x80] sm:$0xff]  ;;  %v80_v38 = vld [vmem:[#allocation5 + $0x88] sm:$0xff] }
  0x42   :  { %1194 = vmatprep.subr.bf16.mxu0 %v1417_v3  ;;  %v102_v39 = vpack.c.bf16 %v78_v36, %v77_v35  ;;  %v103_v40 = vpack.c.bf16 %v80_v38, %v79_v37  ;;  %v81_v41 = vld [vmem:[#allocation5 + $0x90] sm:$0xff]  ;;  %v82_v42 = vld [vmem:[#allocation5 + $0x98] sm:$0xff]  ;;  %v83_v43 = vld [vmem:[#allocation5 + $0xa0] sm:$0xff] }
  0x43   :  { %v84_v44 = vld [vmem:[#allocation5 + $0xa8] sm:$0xff]  ;;  %v104_v45 = vpack.c.bf16 %v82_v42, %v81_v41  ;;  %v85_v47 = vld [vmem:[#allocation5 + $0xb0] sm:$0xff]  ;;  %v86_v48 = vld [vmem:[#allocation5 + $0xb8] sm:$0xff] }
  0x44   :  { %1241 = vmatpush3.bf16.msra.mxu1 %v1424_v12  ;;  %v105_v46 = vpack.c.bf16 %v84_v44, %v83_v43  ;;  %v87_v49 = vld [vmem:[#allocation5 + $0xc0] sm:$0xff]  ;;  %v88_v50 = vld [vmem:[#allocation5 + $0xc8] sm:$0xff]  ;;  %v106_v51 = vpack.c.bf16 %v86_v48, %v85_v47  ;;  %v89_v53 = vld [vmem:[#allocation5 + $0xd0] sm:$0xff] }
  0x45   :  { %1195 = vmatpush3.bf16.msra.mxu0 %v1417_v3  ;;  %1242 = vmatprep.subr.bf16.mxu1 %v1425_v16  ;;  %v107_v52 = vpack.c.bf16 %v88_v50, %v87_v49  ;;  %v90_v54 = vld [vmem:[#allocation5 + $0xd8] sm:$0xff]  ;;  %v91_v55 = vld [vmem:[#allocation5 + $0xe0] sm:$0xff]  ;;  %v92_v56 = vld [vmem:[#allocation5 + $0xe8] sm:$0xff] }
  0x46   :  { %1196 = vmatprep.subr.bf16.mxu0 %v1418_v7  ;;  %v108_v57 = vpack.c.bf16 %v90_v54, %v89_v53  ;;  %v109_v58 = vpack.c.bf16 %v92_v56, %v91_v55  ;;  %v93_v59 = vld [vmem:[#allocation5 + $0xf0] sm:$0xff]  ;;  %v94_v60 = vld [vmem:[#allocation5 + $0xf8] sm:$0xff]  ;;  %v1430_v0 = vld [vmem:[#allocation7 + $0x80] sm:$0xff]  }
  0x47   :  { %v110_v61 = vpack.c.bf16 %v94_v60, %v93_v59  ;;  %v1428_v62 = vld [vmem:[#allocation7 + $0x70] sm:$0xff]   ;;  %v1429_v63 = vld [vmem:[#allocation7 + $0x78] sm:$0xff]   ;;  %v1431_v2 = vld [vmem:[#allocation7 + $0x88] sm:$0xff]  }
  0x48   :  { %1243 = vmatpush3.bf16.msra.mxu1 %v1425_v16  ;;  %v1432_v3 = vld [vmem:[#allocation7 + $0x90] sm:$0xff]   ;;  %v1433_v4 = vld [vmem:[#allocation7 + $0x98] sm:$0xff]   ;;  %v1434_v5 = vld [vmem:[#allocation7 + $0xa0] sm:$0xff]  }
  0x49   :  { %1197 = vmatpush3.bf16.msra.mxu0 %v1418_v7  ;;  %1244 = vmatprep.subr.bf16.mxu1 %v1426_v19  ;;  %v1435_v6 = vld [vmem:[#allocation7 + $0xa8] sm:$0xff]   ;;  %v1436_v7 = vld [vmem:[#allocation7 + $0xb0] sm:$0xff]   ;;  %v61_v10 = vld [vmem:[#allocation2 + $0x8] sm:$0xff] }
  0x4a   :  { %1198 = vmatprep.subr.bf16.mxu0 %v1419_v8 }
  0x4c   :  { %1245 = vmatpush3.bf16.msra.mxu1 %v1426_v19 }
  0x4d   :  { %1199 = vmatpush3.bf16.msra.mxu0 %v1419_v8  ;;  %1246 = vmatprep.subr.bf16.mxu1 %v1427_v24  ;;  %v1437_v8 = vld [vmem:[#allocation7 + $0xb8] sm:$0xff]  }
  0x4e   :  { %1200 = vmatprep.subr.bf16.mxu0 %v1420_v9 }
  0x50   :  { %1247 = vmatpush3.bf16.msra.mxu1 %v1427_v24 }
  0x51   :  { %1201 = vmatpush3.bf16.msra.mxu0 %v1420_v9  ;;  %1248 = vmatprep.subr.bf16.mxu1 %v1428_v62  ;;  %v60_v9 = vld [vmem:[#allocation2] sm:$0xff] }
  0x52   :  { %1202 = vmatprep.subr.bf16.mxu0 %v1421_v13  ;;  %v62_v11 = vpack.c.bf16 %v61_v10, %v60_v9 }
  0x54   :  { %1249 = vmatpush3.bf16.msra.mxu1 %v1428_v62 }
  0x55   :  { %1203 = vmatpush3.bf16.msra.mxu0 %v1421_v13  ;;  %1250 = vmatprep.subr.bf16.mxu1 %v1429_v63  ;;  %v1649_v13 = vld [vmem:[%s1863_s3] ss:$0 sm:$0xff] }
  0x56   :  { %1284 = vmatprep.subr.bf16.mxu0 %v1555_v1 }
  0x58   :  { %1205 = vmatmul.mubr.bf16.vlgmr.msra.gmra.mrb[0].mxu0 %v96_v20  ;;  %1251 = vmatpush3.bf16.msra.mxu1 %v1429_v63 }
  0x59   :  { %1208 = vmatprep.mubr.bf16.mxu0 %v97_v21  ;;  %1304 = vmatprep.subr.bf16.mxu1 %v1555_v1 }
  0x5a   :  { %1285 = vmatpush3.bf16.msra.mxu0 %v1430_v0 }
  0x5b   :  { %1286 = vmatprep.subr.bf16.mxu0 %v1555_v1 }
  0x5e   :  { %1287 = vmatpush3.bf16.msra.mxu0 %v1431_v2 }
  0x5f   :  { %1288 = vmatprep.subr.bf16.mxu0 %v1555_v1 }
  0x60   :  { %1209 = vmatmul.mubr.bf16.gmra.mrb[4].mxu0 %v98_v27 }
  0x61   :  { %1212 = vmatprep.mubr.bf16.mxu0 %v99_v28 }
  0x62   :  { %1289 = vmatpush3.bf16.msra.mxu0 %v1432_v3 }
  0x63   :  { %1290 = vmatprep.subr.bf16.mxu0 %v1555_v1 }
  0x66   :  { %1291 = vmatpush3.bf16.msra.mxu0 %v1433_v4 }
  0x67   :  { %1292 = vmatprep.subr.bf16.mxu0 %v1555_v1 }
  0x68   :  { %1213 = vmatmul.mubr.bf16.gmra.mrb[8].mxu0 %v100_v33 }
  0x69   :  { %1216 = vmatprep.mubr.bf16.mxu0 %v101_v34 }
  0x6a   :  { %1293 = vmatpush3.bf16.msra.mxu0 %v1434_v5 }
  0x6b   :  { %1294 = vmatprep.subr.bf16.mxu0 %v1555_v1 }
  0x6e   :  { %1295 = vmatpush3.bf16.msra.mxu0 %v1435_v6 }
  0x6f   :  { %1296 = vmatprep.subr.bf16.mxu0 %v1555_v1 }
  0x70   :  { %1217 = vmatmul.mubr.bf16.gmra.mrb[12].mxu0 %v102_v39 }
  0x71   :  { %1220 = vmatprep.mubr.bf16.mxu0 %v103_v40 }
  0x72   :  { %1297 = vmatpush3.bf16.msra.mxu0 %v1436_v7 }
  0x73   :  { %1298 = vmatprep.subr.bf16.mxu0 %v1555_v1 }
  0x76   :  { %1299 = vmatpush3.bf16.msra.mxu0 %v1437_v8 }
  0x77   :  { %1324 = vmatprep.subr.bf16.mxu0 %v1555_v1 }
  0x78   :  { %1221 = vmatmul.mubr.bf16.gmra.mrb[16].mxu0 %v104_v45 }
  0x79   :  { %1224 = vmatprep.mubr.bf16.mxu0 %v105_v46 }
  0x80   :  { %1225 = vmatmul.mubr.bf16.gmra.mrb[20].mxu0 %v106_v51 }
  0x81   :  { %1228 = vmatprep.mubr.bf16.mxu0 %v107_v52 }
  0x88   :  { %1229 = vmatmul.mubr.bf16.gmra.mrb[24].mxu0 %v108_v57 }
  0x89   :  { %1232 = vmatprep.mubr.bf16.mxu0 %v109_v58 }
  0x90   :  { %1233 = vmatmul.mubr.bf16.gmra.mrb[28].mxu0 %v110_v61 }
  0x91   :  { %1300 = vmatprep.mubr.msk.bf16.mxu0 %vm1556_vm0, %v1555_v1 }
  0x98   :  { %1301 = vmatmul.mubr.bf16.vlgmr.msra.gmra.mrb[32].mxu0 %v62_v11 }
  0x99   :  { %1340 = vmatprep.mubr.msk.bf16.mxu0 %vm1556_vm0, %v1555_v1 }
 0x12b   :  { %v1206_v12 = vpop.f32.mrb[0].mxu0 }
 0x12c   :  { %v216_v14 = vpop.f32.mrb[1].mxu0  ;;  %v225_v16 = vadd.f32 %v1206_v12, %v1649_v13 }
 0x12d   :  { %v1207_v15 = vpop.f32.mrb[2].mxu0  ;;  %v217_v19 = vadd.f32 %v1649_v13, %v216_v14 }
 0x12e   :  { %v228_v17 = vadd.f32 %v1207_v15, %v1649_v13  ;;  %v219_v18 = vpop.f32.mrb[3].mxu0 }
 0x12f   :  { %v220_v20 = vadd.f32 %v1649_v13, %v219_v18 }
 0x130   :  { %v1655_v21 = vpack.c.bf16 %v228_v17, %v225_v16 }
 0x131   :  { %v1657_v22 = vpack.c.bf16 %v220_v20, %v217_v19 }
 0x133   :  { %v1210_v23 = vpop.f32.mrb[4].mxu0  ;;  %1252 = vmatprep.mubr.bf16.mxu1 %v1657_v22 }
 0x134   :  { %v232_v24 = vpop.f32.mrb[5].mxu0  ;;  %1253 = vmatmul.mubr.bf16.vlgmr.msra.gmra.mrb[0].mxu1 %v1655_v21  ;;  %v241_v26 = vadd.f32 %v1210_v23, %v1649_v13 }
 0x135   :  { %v1211_v25 = vpop.f32.mrb[6].mxu0  ;;  %v233_v29 = vadd.f32 %v1649_v13, %v232_v24 }
 0x136   :  { %v244_v27 = vadd.f32 %v1211_v25, %v1649_v13  ;;  %v235_v28 = vpop.f32.mrb[7].mxu0 }
 0x137   :  { %v236_v30 = vadd.f32 %v1649_v13, %v235_v28 }
 0x138   :  { %v1665_v31 = vpack.c.bf16 %v244_v27, %v241_v26 }
 0x139   :  { %v1667_v32 = vpack.c.bf16 %v236_v30, %v233_v29 }
 0x13b   :  { %v1214_v33 = vpop.f32.mrb[8].mxu0  ;;  %1256 = vmatprep.mubr.bf16.mxu1 %v1667_v32 }
 0x13c   :  { %v248_v34 = vpop.f32.mrb[9].mxu0  ;;  %1257 = vmatmul.mubr.bf16.gmra.mrb[4].mxu1 %v1665_v31  ;;  %v257_v36 = vadd.f32 %v1214_v33, %v1649_v13 }
 0x13d   :  { %v1215_v35 = vpop.f32.mrb[10].mxu0  ;;  %v249_v39 = vadd.f32 %v1649_v13, %v248_v34 }
 0x13e   :  { %v260_v37 = vadd.f32 %v1215_v35, %v1649_v13  ;;  %v251_v38 = vpop.f32.mrb[11].mxu0 }
 0x13f   :  { %v252_v40 = vadd.f32 %v1649_v13, %v251_v38 }
 0x140   :  { %v1675_v41 = vpack.c.bf16 %v260_v37, %v257_v36 }
 0x141   :  { %v1677_v42 = vpack.c.bf16 %v252_v40, %v249_v39 }
 0x143   :  { %v1218_v43 = vpop.f32.mrb[12].mxu0  ;;  %1260 = vmatprep.mubr.bf16.mxu1 %v1677_v42 }
 0x144   :  { %v264_v44 = vpop.f32.mrb[13].mxu0  ;;  %1261 = vmatmul.mubr.bf16.gmra.mrb[8].mxu1 %v1675_v41  ;;  %v273_v46 = vadd.f32 %v1218_v43, %v1649_v13 }
 0x145   :  { %v1219_v45 = vpop.f32.mrb[14].mxu0  ;;  %v265_v49 = vadd.f32 %v1649_v13, %v264_v44 }
 0x146   :  { %v276_v47 = vadd.f32 %v1219_v45, %v1649_v13  ;;  %v267_v48 = vpop.f32.mrb[15].mxu0 }
 0x147   :  { %v268_v50 = vadd.f32 %v1649_v13, %v267_v48 }
 0x148   :  { %v1685_v51 = vpack.c.bf16 %v276_v47, %v273_v46 }
 0x149   :  { %v1687_v52 = vpack.c.bf16 %v268_v50, %v265_v49 }
 0x14b   :  { %v1222_v53 = vpop.f32.mrb[16].mxu0  ;;  %1264 = vmatprep.mubr.bf16.mxu1 %v1687_v52 }
 0x14c   :  { %v280_v54 = vpop.f32.mrb[17].mxu0  ;;  %1265 = vmatmul.mubr.bf16.gmra.mrb[12].mxu1 %v1685_v51  ;;  %v289_v56 = vadd.f32 %v1222_v53, %v1649_v13 }
 0x14d   :  { %v1223_v55 = vpop.f32.mrb[18].mxu0  ;;  %v281_v59 = vadd.f32 %v1649_v13, %v280_v54 }
 0x14e   :  { %v292_v57 = vadd.f32 %v1223_v55, %v1649_v13  ;;  %v283_v58 = vpop.f32.mrb[19].mxu0 }
 0x14f   :  { %v284_v60 = vadd.f32 %v1649_v13, %v283_v58 }
 0x150   :  { %v1695_v61 = vpack.c.bf16 %v292_v57, %v289_v56 }
 0x151   :  { %v1697_v62 = vpack.c.bf16 %v284_v60, %v281_v59 }
 0x153   :  { %1268 = vmatprep.mubr.bf16.mxu1 %v1697_v62  ;;  %v1226_v63 = vpop.f32.mrb[20].mxu0 }
 0x154   :  { %v305_v0 = vadd.f32 %v1226_v63, %v1649_v13  ;;  %1269 = vmatmul.mubr.bf16.gmra.mrb[16].mxu1 %v1695_v61  ;;  %v296_v2 = vpop.f32.mrb[21].mxu0 }
 0x155   :  { %v297_v3 = vadd.f32 %v1649_v13, %v296_v2  ;;  %v1227_v4 = vpop.f32.mrb[22].mxu0 }
 0x156   :  { %v308_v5 = vadd.f32 %v1227_v4, %v1649_v13  ;;  %v299_v6 = vpop.f32.mrb[23].mxu0 }
 0x157   :  { %v300_v7 = vadd.f32 %v1649_v13, %v299_v6 }
 0x158   :  { %v1705_v8 = vpack.c.bf16 %v308_v5, %v305_v0 }
 0x159   :  { %v1707_v9 = vpack.c.bf16 %v300_v7, %v297_v3 }
 0x15b   :  { %1272 = vmatprep.mubr.bf16.mxu1 %v1707_v9  ;;  %v1230_v10 = vpop.f32.mrb[24].mxu0 }
 0x15c   :  { %1273 = vmatmul.mubr.bf16.gmra.mrb[20].mxu1 %v1705_v8  ;;  %v321_v11 = vadd.f32 %v1230_v10, %v1649_v13  ;;  %v312_v12 = vpop.f32.mrb[25].mxu0 }
 0x15d   :  { %v313_v14 = vadd.f32 %v1649_v13, %v312_v12  ;;  %v1231_v15 = vpop.f32.mrb[26].mxu0 }
 0x15e   :  { %v324_v16 = vadd.f32 %v1231_v15, %v1649_v13  ;;  %v315_v17 = vpop.f32.mrb[27].mxu0 }
 0x15f   :  { %v316_v18 = vadd.f32 %v1649_v13, %v315_v17 }
 0x160   :  { %v1715_v19 = vpack.c.bf16 %v324_v16, %v321_v11 }
 0x161   :  { %v1717_v20 = vpack.c.bf16 %v316_v18, %v313_v14 }
 0x163   :  { %1276 = vmatprep.mubr.bf16.mxu1 %v1717_v20  ;;  %v1234_v23 = vpop.f32.mrb[28].mxu0 }
 0x164   :  { %1277 = vmatmul.mubr.bf16.gmra.mrb[24].mxu1 %v1715_v19  ;;  %v337_v24 = vadd.f32 %v1234_v23, %v1649_v13  ;;  %v328_v25 = vpop.f32.mrb[29].mxu0 }
 0x165   :  { %v329_v26 = vadd.f32 %v1649_v13, %v328_v25  ;;  %v1235_v27 = vpop.f32.mrb[30].mxu0 }
 0x166   :  { %v340_v28 = vadd.f32 %v1235_v27, %v1649_v13  ;;  %v331_v29 = vpop.f32.mrb[31].mxu0 }
 0x167   :  { %v332_v30 = vadd.f32 %v1649_v13, %v331_v29  ;;  %v1740_v13 = vld [vmem:[%s1863_s3 + $0x1] ss:$0 sm:$0xff] }
 0x168   :  { %v1725_v33 = vpack.c.bf16 %v340_v28, %v337_v24 }
 0x169   :  { %v1727_v34 = vpack.c.bf16 %v332_v30, %v329_v26 }
 0x16b   :  { %1280 = vmatprep.mubr.bf16.mxu1 %v1727_v34  ;;  %v1733_v35 = vpop.f32.mrb[32].mxu0 }
 0x16c   :  { %1281 = vmatmul.mubr.bf16.gmra.mrb[28].mxu1 %v1725_v33  ;;  %v1302_v36 = vpop.f32.mrb[33].mxu0 }
 0x16d   :  { %1320 = vmatprep.mubr.msk.bf16.mxu1 %vm1556_vm0, %v1555_v1  ;;  %v1735_v37 = vpop.f32.mrb[34].mxu0 }
 0x16e   :  { %v1303_v38 = vpop.f32.mrb[35].mxu0 }
 0x207   :  { %v1254_v39 = vpop.f32.mrb[0].mxu1 }
 0x208   :  { %v466_v40 = vpop.f32.mrb[1].mxu1  ;;  %v475_v44 = vadd.f32 %v1254_v39, %v1740_v13 }
 0x209   :  { %v1255_v43 = vpop.f32.mrb[2].mxu1  ;;  %v467_v47 = vadd.f32 %v1740_v13, %v466_v40 }
 0x20a   :  { %v478_v45 = vadd.f32 %v1255_v43, %v1740_v13  ;;  %v469_v46 = vpop.f32.mrb[3].mxu1 }
 0x20b   :  { %v470_v48 = vadd.f32 %v1740_v13, %v469_v46 }
 0x20c   :  { %v710_v49 = vpack.c.bf16 %v478_v45, %v475_v44 }
 0x20d   :  { %v709_v50 = vpack.c.bf16 %v470_v48, %v467_v47 }
 0x20f   :  { %v1258_v53 = vpop.f32.mrb[4].mxu1  ;;  %1305 = vmatpush3.bf16.xpose.msra.mxu1 %v709_v50 }
 0x210   :  { %v482_v54 = vpop.f32.mrb[5].mxu1  ;;  %1306 = vmatprep.subr.bf16.mxu1 %v1555_v1  ;;  %v491_v56 = vadd.f32 %v1258_v53, %v1740_v13 }
 0x211   :  { %v1259_v55 = vpop.f32.mrb[6].mxu1  ;;  %v483_v59 = vadd.f32 %v1740_v13, %v482_v54 }
 0x212   :  { %v494_v57 = vadd.f32 %v1259_v55, %v1740_v13  ;;  %v485_v58 = vpop.f32.mrb[7].mxu1 }
 0x213   :  { %v486_v60 = vadd.f32 %v1740_v13, %v485_v58 }
 0x214   :  { %v712_v63 = vpack.c.bf16 %v494_v57, %v491_v56 }
 0x215   :  { %v711_v0 = vpack.c.bf16 %v486_v60, %v483_v59 }
 0x217   :  { %v1262_v2 = vpop.f32.mrb[8].mxu1  ;;  %1307 = vmatpush3.bf16.xpose.msra.mxu1 %v710_v49 }
 0x218   :  { %v498_v3 = vpop.f32.mrb[9].mxu1  ;;  %1308 = vmatprep.subr.bf16.mxu1 %v1555_v1  ;;  %v507_v5 = vadd.f32 %v1262_v2, %v1740_v13 }
 0x219   :  { %v1263_v4 = vpop.f32.mrb[10].mxu1  ;;  %v499_v10 = vadd.f32 %v1740_v13, %v498_v3 }
 0x21a   :  { %v510_v6 = vadd.f32 %v1263_v4, %v1740_v13  ;;  %v501_v7 = vpop.f32.mrb[11].mxu1 }
 0x21b   :  { %v502_v11 = vadd.f32 %v1740_v13, %v501_v7 }
 0x21c   :  { %v714_v12 = vpack.c.bf16 %v510_v6, %v507_v5 }
 0x21d   :  { %v713_v14 = vpack.c.bf16 %v502_v11, %v499_v10 }
 0x21f   :  { %v1266_v15 = vpop.f32.mrb[12].mxu1  ;;  %1309 = vmatpush3.bf16.xpose.msra.mxu1 %v711_v0 }
 0x220   :  { %v514_v16 = vpop.f32.mrb[13].mxu1  ;;  %1310 = vmatprep.subr.bf16.mxu1 %v1555_v1  ;;  %v1758_v18 = vadd.f32 %v1266_v15, %v1740_v13 }
 0x221   :  { %v1267_v17 = vpop.f32.mrb[14].mxu1  ;;  %v515_v25 = vadd.f32 %v1740_v13, %v514_v16 }
 0x222   :  { %v526_v23 = vadd.f32 %v1267_v17, %v1740_v13  ;;  %v517_v24 = vpop.f32.mrb[15].mxu1 }
 0x223   :  { %v518_v26 = vadd.f32 %v1740_v13, %v517_v24 }
 0x224   :  { %v716_v27 = vpack.c.bf16 %v526_v23, %v1758_v18  ;;  %v1067_v18 = vld [vmem:[%s1863_s3 + $0x2] ss:$0 sm:$0xff] }
 0x225   :  { %v715_v28 = vpack.c.bf16 %v518_v26, %v515_v25  ;;  %v701_v26 = vadd.f32 %v1067_v18, %v1733_v35 }
 0x227   :  { %v1270_v29 = vpop.f32.mrb[16].mxu1  ;;  %1311 = vmatpush3.bf16.xpose.msra.mxu1 %v712_v63 }
 0x228   :  { %v530_v30 = vpop.f32.mrb[17].mxu1  ;;  %1312 = vmatprep.subr.bf16.mxu1 %v1555_v1  ;;  %v539_v38 = vadd.f32 %v1270_v29, %v1740_v13 }
 0x229   :  { %v1271_v36 = vpop.f32.mrb[18].mxu1  ;;  %v531_v43 = vadd.f32 %v1740_v13, %v530_v30 }
 0x22a   :  { %v542_v39 = vadd.f32 %v1271_v36, %v1740_v13  ;;  %v533_v40 = vpop.f32.mrb[19].mxu1 }
 0x22b   :  { %v534_v44 = vadd.f32 %v1740_v13, %v533_v40 }
 0x22c   :  { %v718_v45 = vpack.c.bf16 %v542_v39, %v539_v38 }
 0x22d   :  { %v717_v46 = vpack.c.bf16 %v534_v44, %v531_v43 }
 0x22f   :  { %1313 = vmatpush3.bf16.xpose.msra.mxu1 %v713_v14  ;;  %1325 = vmatpush3.bf16.xpose.msra.mxu0 %v717_v46  ;;  %v1274_v47 = vpop.f32.mrb[20].mxu1 }
 0x230   :  { %v555_v48 = vadd.f32 %v1274_v47, %v1740_v13  ;;  %v546_v49 = vpop.f32.mrb[21].mxu1  ;;  %1314 = vmatprep.subr.bf16.mxu1 %v1555_v1  ;;  %1326 = vmatprep.subr.bf16.mxu0 %v1555_v1 }
 0x231   :  { %v547_v50 = vadd.f32 %v1740_v13, %v546_v49  ;;  %v1275_v53 = vpop.f32.mrb[22].mxu1 }
 0x232   :  { %v558_v54 = vadd.f32 %v1275_v53, %v1740_v13  ;;  %v549_v55 = vpop.f32.mrb[23].mxu1 }
 0x233   :  { %v550_v56 = vadd.f32 %v1740_v13, %v549_v55  ;;  %v1444_v55 = vld [vmem:[#allocation7 + $0xf0] sm:$0xff]  }
 0x234   :  { %v720_v57 = vpack.c.bf16 %v558_v54, %v555_v48  ;;  %v1440_v54 = vld [vmem:[#allocation7 + $0xd0] sm:$0xff]  }
 0x235   :  { %v719_v58 = vpack.c.bf16 %v550_v56, %v547_v50  ;;  %v1445_v56 = vld [vmem:[#allocation7 + $0xf8] sm:$0xff]  }
 0x237   :  { %1315 = vmatpush3.bf16.xpose.msra.mxu1 %v714_v12  ;;  %1327 = vmatpush3.bf16.xpose.msra.mxu0 %v718_v45  ;;  %v1278_v59 = vpop.f32.mrb[24].mxu1 }
 0x238   :  { %1316 = vmatprep.subr.bf16.mxu1 %v1555_v1  ;;  %1328 = vmatprep.subr.bf16.mxu0 %v1555_v1  ;;  %v571_v60 = vadd.f32 %v1278_v59, %v1740_v13  ;;  %v562_v63 = vpop.f32.mrb[25].mxu1 }
 0x239   :  { %v563_v0 = vadd.f32 %v1740_v13, %v562_v63  ;;  %v1279_v2 = vpop.f32.mrb[26].mxu1 }
 0x23a   :  { %v574_v3 = vadd.f32 %v1279_v2, %v1740_v13  ;;  %v565_v4 = vpop.f32.mrb[27].mxu1 }
 0x23b   :  { %v566_v5 = vadd.f32 %v1740_v13, %v565_v4 }
 0x23c   :  { %v722_v6 = vpack.c.bf16 %v574_v3, %v571_v60 }
 0x23d   :  { %v721_v7 = vpack.c.bf16 %v566_v5, %v563_v0  ;;  %v1077_v5 = vld [vmem:[%s1863_s3 + $0x3] ss:$0 sm:$0xff] }
 0x23f   :  { %1317 = vmatpush3.bf16.xpose.msra.mxu1 %v715_v28  ;;  %1329 = vmatpush3.bf16.xpose.msra.mxu0 %v719_v58  ;;  %v1282_v10 = vpop.f32.mrb[28].mxu1  ;;  %v707_v28 = vpack.c.bf16 %v701_v26, %v701_v26 }
 0x240   :  { %1318 = vmatprep.subr.bf16.mxu1 %v1555_v1  ;;  %1330 = vmatprep.subr.bf16.mxu0 %v1555_v1  ;;  %v587_v11 = vadd.f32 %v1282_v10, %v1740_v13  ;;  %v578_v12 = vpop.f32.mrb[29].mxu1 }
 0x241   :  { %v579_v14 = vadd.f32 %v1740_v13, %v578_v12  ;;  %v1283_v15 = vpop.f32.mrb[30].mxu1 }
 0x242   :  { %v590_v16 = vadd.f32 %v1283_v15, %v1740_v13  ;;  %v581_v17 = vpop.f32.mrb[31].mxu1 }
 0x243   :  { %v582_v23 = vadd.f32 %v1740_v13, %v581_v17 }
 0x244   :  { %v724_v24 = vpack.c.bf16 %v590_v16, %v587_v11 }
 0x245   :  { %v723_v25 = vpack.c.bf16 %v582_v23, %v579_v14 }
 0x247   :  { %1319 = vmatpush3.bf16.xpose.msra.mxu1 %v716_v27  ;;  %1331 = vmatpush3.bf16.xpose.msra.mxu0 %v720_v57 }
 0x248   :  { %1332 = vmatprep.subr.bf16.mxu0 %v1555_v1  ;;  %1344 = vmatprep.subr.bf16.mxu1 %v1555_v1 }
 0x24e   :  { %1321 = vmatmul.mubr.bf16.vlgmr.msra.gmra.mrb[32].mxu1 %v707_v28 }
 0x24f   :  { %1333 = vmatpush3.bf16.xpose.msra.mxu0 %v721_v7  ;;  %1345 = vmatpush3.bf16.msra.mxu1 %v1657_v22 }
 0x250   :  { %1346 = vmatprep.subr.bf16.mxu1 %v1555_v1  ;;  %1334 = vmatprep.subr.bf16.mxu0 %v1555_v1 }
 0x251   :  { %1360 = vmatprep.mubr.msk.bf16.mxu1 %vm1556_vm0, %v1555_v1 }
 0x253   :  { %1347 = vmatpush3.bf16.msra.mxu1 %v1655_v21  ;;  %v704_v21 = vadd.f32 %v1067_v18, %v1735_v37 }
 0x254   :  { %1348 = vmatprep.subr.bf16.mxu1 %v1555_v1 }
 0x255   :  { %v708_v22 = vpack.c.bf16 %v704_v21, %v704_v21 }
 0x257   :  { %1335 = vmatpush3.bf16.xpose.msra.mxu0 %v722_v6  ;;  %1349 = vmatpush3.bf16.msra.mxu1 %v1667_v32 }
 0x258   :  { %1350 = vmatprep.subr.bf16.mxu1 %v1555_v1  ;;  %1336 = vmatprep.subr.bf16.mxu0 %v1555_v1 }
 0x25b   :  { %1351 = vmatpush3.bf16.msra.mxu1 %v1665_v31  ;;  %v805_v31 = vlaneseq }
 0x25c   :  { %1352 = vmatprep.subr.bf16.mxu1 %v1555_v1 }
 0x25d   :  { %v806_v32 = vand.u32 127, %v805_v31 }
 0x25f   :  { %1337 = vmatpush3.bf16.xpose.msra.mxu0 %v723_v25  ;;  %1353 = vmatpush3.bf16.msra.mxu1 %v1677_v42  ;;  %vm807_vm1 = vcmp.lt.s32.totalorder %v806_v32, 16 }
 0x260   :  { %1354 = vmatprep.subr.bf16.mxu1 %v1555_v1  ;;  %1338 = vmatprep.subr.bf16.mxu0 %v1555_v1 }
 0x263   :  { %1355 = vmatpush3.bf16.msra.mxu1 %v1675_v41 }
 0x264   :  { %1356 = vmatprep.subr.bf16.mxu1 %v1555_v1 }
 0x267   :  { %1339 = vmatpush3.bf16.xpose.msra.mxu0 %v724_v24  ;;  %1357 = vmatpush3.bf16.msra.mxu1 %v1687_v52 }
 0x268   :  { %1358 = vmatprep.subr.bf16.mxu1 %v1555_v1  ;;  %1384 = vmatprep.subr.bf16.mxu0 %v1555_v1 }
 0x26b   :  { %1359 = vmatpush3.bf16.msra.mxu1 %v1685_v51 }
 0x26c   :  { %1364 = vmatprep.subr.bf16.mxu1 %v1555_v1 }
 0x26e   :  { %1341 = vmatmul.mubr.bf16.vlgmr.msra.gmra.mrb[36].mxu0 %v708_v22 }
 0x26f   :  { %1400 = vmatprep.mubr.msk.bf16.mxu0 %vm1556_vm0, %v1555_v1 }
 0x321   :  { %v759_v41 = vpop.f32.mrb[32].mxu1 }
 0x322   :  { %v1322_v42 = vpop.f32.mrb[33].mxu1  ;;  %v810_v52 = vsel %vm807_vm1, %v759_v41, -1e+30 }
 0x323   :  { %812 = vmax.xlane.f32.xlu0 %v810_v52  ;;  %v762_v35 = vpop.f32.mrb[34].mxu1 }
 0x324   :  { %v1323_v37 = vpop.f32.mrb[35].mxu1 }
 0x341   :  { %v799_v13 = vpop.f32.mrb[36].mxu0 }
 0x342   :  { %v1342_v27 = vpop.f32.mrb[37].mxu0  ;;  %v811_v29 = vsel %vm807_vm1, %v799_v13, -1e+30 }
 0x343   :  { %814 = vmax.xlane.f32.xlu0 %v811_v29  ;;  %v802_v51 = vpop.f32.mrb[38].mxu0 }
 0x344   :  { %v1343_v30 = vpop.f32.mrb[39].mxu0 }
 0x3b0   :  { %v813_v36 = vpop.xlane.xlu0 %812 }
 0x3b1   :  { %v816_v38 = vsub.f32 %v810_v52, %v813_v36 }
 0x3b3   :  { %v818_v39 = vmul.f32 1.442695, %v816_v38 }
 0x3b5   :  { %1446 = vpow2.f32 %v818_v39 }
 0x3bf   :  { %v1447_v40 = vpop.eup %1446 }
 0x3c0   :  { %822 = vadd.xlane.f32.xlu1 %v1447_v40 }
 0x3d0   :  { %v815_v43 = vpop.xlane.xlu0 %814 }
 0x3d1   :  { %v817_v44 = vsub.f32 %v811_v29, %v815_v43 }
 0x3d3   :  { %v820_v45 = vmul.f32 1.442695, %v817_v44 }
 0x3d5   :  { %1448 = vpow2.f32 %v820_v45 }
 0x3df   :  { %v1449_v46 = vpop.eup %1448 }
 0x3e0   :  { %824 = vadd.xlane.f32.xlu1 %v1449_v46 }
 0x44d   :  { %v823_v47 = vpop.xlane.xlu1 %822 }
 0x44e   :  { %1450 = vrcp.f32 %v823_v47 }
 0x458   :  { %v1451_v48 = vpop.eup %1450 }
 0x459   :  { %v828_v49 = vmul.f32 %v1451_v48, %v1447_v40 }
 0x45b   :  { %v830_v50 = vpack.c.bf16 %v828_v49, %v828_v49 }
 0x45d   :  { %1361 = vmatmul.mubr.bf16.vlgmr.msra.gmra.mrb[36].mxu1 %v830_v50 }
 0x45e   :  { %1365 = vmatpush3.bf16.msra.mxu1 %v1697_v62  ;;  %1380 = vmatprep.mubr.msk.bf16.mxu1 %vm1556_vm0, %v1555_v1 }
 0x45f   :  { %1366 = vmatprep.subr.bf16.mxu1 %v1555_v1 }
 0x462   :  { %1367 = vmatpush3.bf16.msra.mxu1 %v1695_v61 }
 0x463   :  { %1368 = vmatprep.subr.bf16.mxu1 %v1555_v1 }
 0x466   :  { %1369 = vmatpush3.bf16.msra.mxu1 %v1707_v9  ;;  %v1438_v9 = vld [vmem:[#allocation7 + $0xc0] sm:$0xff]  }
 0x467   :  { %1370 = vmatprep.subr.bf16.mxu1 %v1555_v1  ;;  %1385 = vmatpush3.bf16.msra.mxu0 %v1438_v9 }
 0x468   :  { %1386 = vmatprep.subr.bf16.mxu0 %v1555_v1 }
 0x46a   :  { %1371 = vmatpush3.bf16.msra.mxu1 %v1705_v8 }
 0x46b   :  { %1372 = vmatprep.subr.bf16.mxu1 %v1555_v1 }
 0x46d   :  { %v825_v53 = vpop.xlane.xlu1 %824 }
 0x46e   :  { %1373 = vmatpush3.bf16.msra.mxu1 %v1717_v20  ;;  %1452 = vrcp.f32 %v825_v53  ;;  %v1439_v20 = vld [vmem:[#allocation7 + $0xc8] sm:$0xff]  }
 0x46f   :  { %1374 = vmatprep.subr.bf16.mxu1 %v1555_v1  ;;  %1387 = vmatpush3.bf16.msra.mxu0 %v1439_v20 }
 0x470   :  { %1388 = vmatprep.subr.bf16.mxu0 %v1555_v1 }
 0x472   :  { %1375 = vmatpush3.bf16.msra.mxu1 %v1715_v19  ;;  %v1441_v19 = vld [vmem:[#allocation7 + $0xd8] sm:$0xff]  }
 0x473   :  { %1376 = vmatprep.subr.bf16.mxu1 %v1555_v1  ;;  %1389 = vmatpush3.bf16.msra.mxu0 %v1440_v54 }
 0x474   :  { %1390 = vmatprep.subr.bf16.mxu0 %v1555_v1 }
 0x476   :  { %1377 = vmatpush3.bf16.msra.mxu1 %v1727_v34  ;;  %v1442_v34 = vld [vmem:[#allocation7 + $0xe0] sm:$0xff]  }
 0x477   :  { %1378 = vmatprep.subr.bf16.mxu1 %v1555_v1  ;;  %1391 = vmatpush3.bf16.msra.mxu0 %v1441_v19 }
 0x478   :  { %v1453_v61 = vpop.eup %1452  ;;  %1392 = vmatprep.subr.bf16.mxu0 %v1555_v1 }
 0x479   :  { %v829_v62 = vmul.f32 %v1453_v61, %v1449_v46 }
 0x47a   :  { %1379 = vmatpush3.bf16.msra.mxu1 %v1725_v33  ;;  %v1443_v33 = vld [vmem:[#allocation7 + $0xe8] sm:$0xff]  }
 0x47b   :  { %v831_v8 = vpack.c.bf16 %v829_v62, %v829_v62  ;;  %1393 = vmatpush3.bf16.msra.mxu0 %v1442_v34 }
 0x47c   :  { %1394 = vmatprep.subr.bf16.mxu0 %v1555_v1 }
 0x47d   :  { %1381 = vmatmul.mubr.bf16.vlgmr.msra.gmra.mrb[40].mxu1 %v831_v8 }
 0x47f   :  { %1395 = vmatpush3.bf16.msra.mxu0 %v1443_v33 }
 0x480   :  { %1396 = vmatprep.subr.bf16.mxu0 %v1555_v1 }
 0x483   :  { %1397 = vmatpush3.bf16.msra.mxu0 %v1444_v55 }
 0x484   :  { %1398 = vmatprep.subr.bf16.mxu0 %v1555_v1 }
 0x487   :  { %1399 = vmatpush3.bf16.msra.mxu0 %v1445_v56 }
 0x530   :  { %v866_v57 = vpop.f32.mrb[36].mxu1 }
 0x531   :  { %v1362_v58 = vpop.f32.mrb[37].mxu1 }
 0x532   :  { %v869_v59 = vpop.f32.mrb[38].mxu1 }
 0x533   :  { %v1363_v60 = vpop.f32.mrb[39].mxu1 }
 0x550   :  { %v906_v63 = vpop.f32.mrb[40].mxu1 }
 0x551   :  { %v912_v0 = vpack.c.bf16 %v906_v63, %v866_v57  ;;  %v1382_v2 = vpop.f32.mrb[41].mxu1 }
 0x552   :  { %v909_v3 = vpop.f32.mrb[42].mxu1 }
 0x553   :  { %v1383_v4 = vpop.f32.mrb[43].mxu1  ;;  %1401 = vmatmul.mubr.bf16.vlgmr.msra.gmra.mrb[40].mxu0 %v912_v0 }
 0x626   :  { %v1020_v6 = vpop.f32.mrb[40].mxu0 }
 0x627   :  { %v1021_v1 = vadd.f32 %v1077_v5, %v1020_v6  ;;  %v1402_v7 = vpop.f32.mrb[41].mxu0 }
 0x628   :  { %v1023_v10 = vpop.f32.mrb[42].mxu0 }
 0x629   :  { %1027 = vst [vmem:[#allocation8] sm:$0xff] %v1021_v1  ;;  %v1024_v11 = vadd.f32 %v1077_v5, %v1023_v10  ;;  %v1403_v12 = vpop.f32.mrb[43].mxu0 }
 0x62b   :  { %1028 = vst [vmem:[#allocation8 + $0x8] sm:$0xff] %v1024_v11 }
 0x62c   :  { %1531 = shalt.err (!%p1528_p0)
}
 0x62d   :  { %s1532_s13 = scalar_lea.hbm %s1864_s4, 256 }
 0x62e   :  { %p1533_p1 = scmp.ne.s32.totalorder %s1864_s4, %s1532_s13  ;;  %p1536_p2 = scmp.lt.u32.totalorder %s1532_s13, %s1864_s4 }
 0x630   :  { %p1538_p3 = pnand %p1536_p2, %p1533_p1 }
 0x632   :  { %1541 = shalt.err (!%p1538_p3)
}
 0x633   :  { %1040 = dma.vmem_to_hbm [thread:$0]  %s1035_s11, 256, %s1864_s4, [#allocation4], %s1550_s27, %s1550_s27, %s1551_s28  }
 0x634   :  { %1546 = dma.done.wait [#allocation4], 256  }
 0x635   :  { %1547 = vsyncadd [#allocation4], 4294967040 }
 0x636   :  { %1044 = vsyncpa [#allocation3], 1 }
 0x637   :  { %1045 = vsyncpa [#allocation6], 1 }
 0x638   :  { %1046 = vsyncpa [#allocation4], 1 }

</bundles_post_ra>
